<compile_context>
chip_gen: v6e
topology: v6e:2x2x1
jax: 0.10.0
libtpu: 0.0.40
codegen_flags: <defaults>
</compile_context>

<pallas_src>
import functools
import math

import jax
import jax.numpy as jnp
from jax import lax
from jax.experimental import pallas as pl
from jax.experimental.pallas import tpu as pltpu


_SUBLANE = 16   # second-to-last block-dim multiple (covers bf16 packing; fine for f32)
_LANE = 128     # last block-dim multiple


def _round_up(x, m):
    return ((x + m - 1) // m) * m


def _default_tiles():
    """Generation-aware tile defaults (biggest tile that comfortably fits VMEM)."""
    try:
        vmem_bytes = pltpu.get_tpu_info().vmem_capacity_bytes
    except Exception:            # conservative fallback if the query is unavailable
        vmem_bytes = 64 << 20
    if vmem_bytes >= (100 << 20):   # v5e / v6e: 128 MiB VMEM per TensorCore
        return 512, 512, 1024
    return 512, 512, 512            # v7x: 64 MiB VMEM per TensorCore


def _pick_block(dim, want, mult):
    """Full-extent block for small dims, otherwise a `mult`-aligned tile."""
    if dim <= want:
        return dim
    return max(mult, (want // mult) * mult)


def _maybe_buffered_spec(shape, index_map, buffer_count):
    """BlockSpec with optional N-deep pipelining; falls back if unsupported."""
    if buffer_count is not None and buffer_count > 2:
        try:
            return pl.BlockSpec(shape, index_map,
                                pipeline_mode=pl.Buffered(buffer_count))
        except TypeError:
            pass
    return pl.BlockSpec(shape, index_map)


def _matmul_kernel(*refs, use_bias, k_rem, acc_in_out):
    """One (bm, bk) x (bk, bn) MXU step; accumulation lives across the K grid axis."""
    if use_bias:
        if acc_in_out:
            a_ref, b_ref, bias_ref, o_ref = refs
            acc_ref = o_ref
        else:
            a_ref, b_ref, bias_ref, o_ref, acc_ref = refs
    else:
        bias_ref = None
        if acc_in_out:
            a_ref, b_ref, o_ref = refs
            acc_ref = o_ref
        else:
            a_ref, b_ref, o_ref, acc_ref = refs

    k = pl.program_id(2)
    nk = pl.num_programs(2)

    @pl.when(k == 0)
    def _():
        acc_ref[...] = jnp.zeros_like(acc_ref)

    a = a_ref[...]
    b = b_ref[...]
    if k_rem:
        # Ragged K handled in-kernel (no host-side jnp.pad of the operands):
        # zero the out-of-range K tail of both operands on the last K step so
        # unspecified out-of-bounds reads can never pollute the accumulator.
        valid = jnp.where(k == nk - 1, k_rem, a.shape[1])
        a = jnp.where(lax.broadcasted_iota(jnp.int32, a.shape, 1) < valid,
                      a, jnp.zeros_like(a))
        b = jnp.where(lax.broadcasted_iota(jnp.int32, b.shape, 0) < valid,
                      b, jnp.zeros_like(b))

    acc_ref[...] += jnp.dot(a, b, preferred_element_type=jnp.float32)

    if acc_in_out:
        if use_bias:
            @pl.when(k == nk - 1)
            def _():
                # Bias applied once per output tile (epilogue), in f32.
                o_ref[...] += bias_ref[...].astype(jnp.float32)
    else:
        @pl.when(k == nk - 1)
        def _():
            out = acc_ref[...]
            if use_bias:
                out = out + bias_ref[...].astype(jnp.float32)
            o_ref[...] = out.astype(o_ref.dtype)


def matmul_pallas(a, b, bias=None, *, out_dtype=None, bm=None, bn=None, bk=None,
                  a_buffer_count=None):
    """out = a @ b (+ bias); tiled MXU matmul, f32 accumulation, no operand padding.

    M/N edge blocks rely on Pallas dropping out-of-bounds writes; the ragged K
    tail is zero-masked inside the kernel.  `bias` must be shaped (1, N) or None.
    """
    M, K = a.shape
    K2, N = b.shape
    assert K == K2, (a.shape, b.shape)
    out_dtype = jnp.dtype(out_dtype or jnp.float32)
    use_bias = bias is not None
    if use_bias:
        assert bias.shape == (1, N), bias.shape

    bm_d, bn_d, bk_d = _default_tiles()
    bm = bm or bm_d
    bn = bn or bn_d
    bk = bk or bk_d

    bm_eff = _pick_block(M, bm, _SUBLANE)
    bn_eff = _pick_block(N, bn, _LANE)
    bk_eff = _pick_block(K, bk, _LANE)

    # v7x has two TensorCores: make sure the parallel (i, j) grid axes expose
    # >= 2 blocks for non-tiny problems so both cores get work.
    if pl.cdiv(M, bm_eff) == 1 and pl.cdiv(N, bn_eff) == 1 and M >= 2 * _LANE:
        bm_eff = _round_up(pl.cdiv(M, 2), _SUBLANE)

    grid = (pl.cdiv(M, bm_eff), pl.cdiv(N, bn_eff), pl.cdiv(K, bk_eff))
    k_rem = (K % bk_eff) if grid[2] > 1 else 0

    # f32 outputs accumulate straight into o_ref (resident across the K axis);
    # narrower outputs go through an f32 VMEM scratch accumulator.
    acc_in_out = (out_dtype == jnp.float32)

    in_specs = [
        _maybe_buffered_spec((bm_eff, bk_eff), lambda i, j, k: (i, k),
                             a_buffer_count if grid[2] > 1 else None),
        pl.BlockSpec((bk_eff, bn_eff), lambda i, j, k: (k, j)),
    ]
    args = [a, b]
    if use_bias:
        in_specs.append(pl.BlockSpec((1, bn_eff), lambda i, j, k: (0, j)))
        args.append(bias)

    cost = pl.CostEstimate(
        flops=2 * M * N * K,
        transcendentals=0,
        bytes_accessed=(M * K * a.dtype.itemsize + K * N * b.dtype.itemsize
                        + M * N * out_dtype.itemsize
                        + (N * 4 if use_bias else 0)),
    )

    return pl.pallas_call(
        functools.partial(_matmul_kernel, use_bias=use_bias, k_rem=k_rem,
                          acc_in_out=acc_in_out),
        out_shape=jax.ShapeDtypeStruct((M, N), out_dtype),
        grid=grid,
        in_specs=in_specs,
        out_specs=pl.BlockSpec((bm_eff, bn_eff), lambda i, j, k: (i, j)),
        scratch_shapes=([] if acc_in_out
                        else [pltpu.VMEM((bm_eff, bn_eff), jnp.float32)]),
        compiler_params=pltpu.CompilerParams(
            dimension_semantics=("parallel", "parallel", "arbitrary"),
            vmem_limit_bytes=32 << 20),
        cost_estimate=cost,
    )(*args)


def _fused_graphconv_kernel(*refs, use_bias):
    """Whole GraphConv in one grid-less call: out = adj @ (x @ w) (+ bias)."""
    if use_bias:
        x_ref, w_ref, adj_ref, bias_ref, o_ref = refs
    else:
        x_ref, w_ref, adj_ref, o_ref = refs
        bias_ref = None

    support = jnp.dot(x_ref[...], w_ref[...], preferred_element_type=jnp.float32)
    out = jnp.dot(adj_ref[...], support.astype(x_ref.dtype),
                  preferred_element_type=jnp.float32)
    if use_bias:
        out = out + bias_ref[...].astype(jnp.float32)
    o_ref[...] = out.astype(o_ref.dtype)


def graph_conv_pallas(x, adj, weight, bias=None, *, compute_dtype=jnp.bfloat16,
                      bm=None, bn=None, bk=None, allow_fused=True,
                      fused_vmem_budget=4 << 20):
    """Forward pass of GraphConv: adj @ (x @ weight) (+ bias), f32 output.

    Operands are fed to the MXU in `compute_dtype` (default bf16: ~2x on the
    HBM-bound adj matmul and the native MXU dtype on v6e/v7x) with f32
    accumulation and an f32 bias epilogue.  Pass compute_dtype=jnp.float32 for
    faithful f32 semantics.  For best performance store/pass x, adj and weight
    already in `compute_dtype` so the casts below are no-ops.
    """
    n_nodes, in_features = x.shape
    out_features = weight.shape[1]
    compute_dtype = jnp.dtype(compute_dtype)

    # TODO(synk): torch.spmm uses a sparse adjacency; adj is treated as a dense
    # matrix here (mathematically identical result).
    xc = x.astype(compute_dtype)
    wc = weight.astype(compute_dtype)
    adjc = adj.astype(compute_dtype)
    bias2d = (None if bias is None
              else bias.astype(jnp.float32).reshape(1, out_features))
    use_bias = bias is not None

    # Single-block fast path: both matmuls + bias fused in one grid-less call,
    # so `support` never touches HBM and there is a single kernel launch.
    isz = compute_dtype.itemsize
    fused_bytes = ((n_nodes * n_nodes + n_nodes * in_features
                    + in_features * out_features) * isz
                   + 2 * n_nodes * out_features * 4
                   + (out_features * 4 if use_bias else 0))
    if allow_fused and fused_bytes <= fused_vmem_budget:
        args = [xc, wc, adjc] + ([bias2d] if use_bias else [])
        return pl.pallas_call(
            functools.partial(_fused_graphconv_kernel, use_bias=use_bias),
            out_shape=jax.ShapeDtypeStruct((n_nodes, out_features), jnp.float32),
        )(*args)

    # Tiled path: support is produced in compute_dtype (half the HBM traffic in
    # bf16) and fed straight to the second matmul -- no pad/slice churn.
    support = matmul_pallas(xc, wc, out_dtype=compute_dtype, bm=bm, bn=bn, bk=bk)
    return matmul_pallas(adjc, support, bias2d, out_dtype=jnp.float32,
                         bm=bm, bn=bn, bk=bk, a_buffer_count=3)


def init_graph_conv_params(key, in_features, out_features, bias=True):
    """Matches GraphConv.reset_parameters: uniform(-stdv, stdv), stdv = 1/sqrt(out)."""
    stdv = 1.0 / math.sqrt(out_features)
    kw, kb = jax.random.split(key)
    weight = jax.random.uniform(kw, (in_features, out_features),
                                dtype=jnp.float32, minval=-stdv, maxval=stdv)
    b = (jax.random.uniform(kb, (out_features,), dtype=jnp.float32,
                            minval=-stdv, maxval=stdv) if bias else None)
    return weight, b


if __name__ == "__main__":
    key = jax.random.PRNGKey(0)
    k_x, k_adj, k_p, k_x2, k_adj2, k_p2 = jax.random.split(key, 6)

    def make_adj(k, n):
        a = (jax.random.uniform(k, (n, n)) < 0.2).astype(jnp.float32)
        a = a + jnp.eye(n, dtype=jnp.float32)
        return a / jnp.sum(a, axis=1, keepdims=True)

    def ref_graphconv(x, adj, w, b):
        s = jnp.dot(x, w, precision="highest")
        out = jnp.dot(adj, s, precision="highest")
        return out if b is None else out + b

    def rel_err(out, ref):
        return float(jnp.linalg.norm(out - ref) / (jnp.linalg.norm(ref) + 1e-30))

    # --- Small case: fused single-block fast path ---------------------------
    n1, fin1, fout1 = 16, 32, 64
    x1 = jax.random.normal(k_x, (n1, fin1), dtype=jnp.float32)
    adj1 = make_adj(k_adj, n1)
    w1, b1 = init_graph_conv_params(k_p, fin1, fout1, bias=True)
    ref1 = ref_graphconv(x1, adj1, w1, b1)

    out_bf = jax.block_until_ready(graph_conv_pallas(x1, adj1, w1, b1))
    assert out_bf.shape == (n1, fout1) and out_bf.dtype == jnp.float32
    assert bool(jnp.isfinite(out_bf).all())
    assert rel_err(out_bf, ref1) < 2e-2, rel_err(out_bf, ref1)

    out_f32 = jax.block_until_ready(
        graph_conv_pallas(x1, adj1, w1, b1, compute_dtype=jnp.float32))
    assert rel_err(out_f32, ref1) < 1e-2, rel_err(out_f32, ref1)

    out_nb = jax.block_until_ready(
        graph_conv_pallas(x1, adj1, w1, None, compute_dtype=jnp.float32))
    assert rel_err(out_nb, ref_graphconv(x1, adj1, w1, None)) < 1e-2

    # --- Larger ragged case: tiled path (M/N edge blocks, multi-step K with a
    # ragged tail + in-kernel masking, bias epilogue, triple-buffered adj) ----
    n2, fin2, fout2 = 300, 96, 160
    x2 = jax.random.normal(k_x2, (n2, fin2), dtype=jnp.float32)
    adj2 = make_adj(k_adj2, n2)
    w2, b2 = init_graph_conv_params(k_p2, fin2, fout2, bias=True)
    ref2 = ref_graphconv(x2, adj2, w2, b2)

    out2_f32 = jax.block_until_ready(
        graph_conv_pallas(x2, adj2, w2, b2, compute_dtype=jnp.float32,
                          allow_fused=False, bm=128, bn=128, bk=128))
    assert out2_f32.shape == (n2, fout2)
    assert rel_err(out2_f32, ref2) < 1e-2, rel_err(out2_f32, ref2)

    out2_bf = jax.block_until_ready(
        graph_conv_pallas(x2, adj2, w2, b2, allow_fused=False,
                          bm=128, bn=128, bk=128))
    assert rel_err(out2_bf, ref2) < 3e-2, rel_err(out2_bf, ref2)

    print("KERNEL_OK")
</pallas_src>

<mosaic_0001>
module attributes {stable_mosaic.version = 11 : i64} {
  func.func @_fused_graphconv_kernel(%arg0: memref<16x32xbf16, #tpu.memory_space<vmem>>, %arg1: memref<32x64xbf16, #tpu.memory_space<vmem>>, %arg2: memref<16x16xbf16, #tpu.memory_space<vmem>>, %arg3: memref<1x64xf32, #tpu.memory_space<vmem>>, %arg4: memref<16x64xf32, #tpu.memory_space<vmem>>) attributes {dimension_semantics = [], scalar_prefetch = 0 : i64, scratch_operands = 0 : i64, tpu.core_type = #tpu.core_type<tc>} {
    %c0 = arith.constant 0 : index
    %c0_0 = arith.constant 0 : index
    %0 = vector.load %arg0[%c0, %c0_0] : memref<16x32xbf16, #tpu.memory_space<vmem>>, vector<16x32xbf16>
    %c0_1 = arith.constant 0 : index
    %c0_2 = arith.constant 0 : index
    %1 = vector.load %arg1[%c0_1, %c0_2] : memref<32x64xbf16, #tpu.memory_space<vmem>>, vector<32x64xbf16>
    %cst = arith.constant dense<0.000000e+00> : vector<16x64xf32>
    %2 = tpu.matmul %0, %1, %cst {dimension_numbers = #tpu.dot_dimension_numbers<[1], [0], [0], [1], [0, 0, 1, 1], [], []>} : vector<16x32xbf16>, vector<32x64xbf16>, vector<16x64xf32> -> vector<16x64xf32>
    %c0_3 = arith.constant 0 : index
    %c0_4 = arith.constant 0 : index
    %3 = vector.load %arg2[%c0_3, %c0_4] : memref<16x16xbf16, #tpu.memory_space<vmem>>, vector<16x16xbf16>
    %4 = arith.truncf %2 : vector<16x64xf32> to vector<16x64xbf16>
    %cst_5 = arith.constant dense<0.000000e+00> : vector<16x64xf32>
    %5 = tpu.matmul %3, %4, %cst_5 {dimension_numbers = #tpu.dot_dimension_numbers<[1], [0], [0], [1], [0, 0, 1, 1], [], []>} : vector<16x16xbf16>, vector<16x64xbf16>, vector<16x64xf32> -> vector<16x64xf32>
    %c0_6 = arith.constant 0 : index
    %c0_7 = arith.constant 0 : index
    %6 = vector.load %arg3[%c0_6, %c0_7] : memref<1x64xf32, #tpu.memory_space<vmem>>, vector<1x64xf32>
    %7 = vector.broadcast %6 : vector<1x64xf32> to vector<16x64xf32>
    %8 = arith.addf %5, %7 : vector<16x64xf32>
    %c0_8 = arith.constant 0 : index
    %c0_9 = arith.constant 0 : index
    %9 = vector.load %arg4[%c0_8, %c0_9] : memref<16x64xf32, #tpu.memory_space<vmem>>, vector<16x64xf32>
    tpu.vector_store %arg4[%c0_8, %c0_9], %8 {strides = array<i32>} : memref<16x64xf32, #tpu.memory_space<vmem>>, vector<16x64xf32>,
    return
  }
}

</mosaic_0001>

<bundles_post_ra>
// kernel: tpu_custom_call.1
= control target key start
LH: loop header
LB: loop body
LE: loop exit
PB: predicated region body
PF: predicated region fallthrough
CT: control target
= control target key end

     0   :  { %9 = vsyncpa [#allocation3], 0  ;;  %s385_s0 = inlined_call_operand.hbm [shape: bf16[16,32], index: 0, kind: input, shape index: {}]   ;;  %s386_s1 = inlined_call_operand.hbm [shape: bf16[32,64], index: 1, kind: input, shape index: {}]   ;;  %s387_s2 = inlined_call_operand.hbm [shape: bf16[16,16], index: 2, kind: input, shape index: {}]   ;;  %s388_s3 = inlined_call_operand.vmem [shape: f32[1,64], index: 3, kind: input, shape index: {}]   ;;  %s389_s4 = inlined_call_operand.hbm [shape: f32[16,64], index: 4, kind: output, shape index: {}]  }
   0x1   :  { %10 = vsyncpa [#allocation6], 0 }
   0x2   :  { %11 = vsyncpa [#allocation4], 0  ;;  %s335_s15 = smov [#allocation5]   ;;  %s336_s17 = smov [#allocation2]  }
   0x3   :  { %s29_s16 = sshll.u32 %s335_s15, 4  ;;  %s17_s18 = sshll.u32 %s336_s17, 4  ;;  %s30_s16 = int_to_ptr.vmem [resolvable:$true] %s29_s16  ;;  %s18_s18 = int_to_ptr.vmem [resolvable:$true] %s17_s18 }
   0x4   :  { %s257_s19 = scalar_lea.vmem %s30_s16, 256  ;;  %p262_p1 = scmp.lt.s32.totalorder %s30_s16, %s30_s16 }
   0x5   :  { %p258_p0 = scmp.ne.s32.totalorder %s30_s16, %s257_s19  ;;  %p263_p2 = scmp.lt.s32.totalorder %s257_s19, %s257_s19 }
   0x7   :  { %p264_p3 = por %p263_p2, %p262_p1 }
   0x9   :  { %p265_p4 = pnand %p264_p3, %p258_p0 }
   0xb   :  { %268 = shalt.err (!%p265_p4)
}
   0xc   :  { %s337_s20 = smov 64   ;;  %s338_s21 = smov 4  }
   0xd   :  { %35 = dma.hbm_to_vmem [thread:$0]  %s386_s1, 256, %s30_s16, [#allocation6], %s337_s20, %s337_s20, %s338_s21  }
   0xe   :  { %s277_s24 = scalar_lea.vmem %s18_s18, 128  ;;  %p282_p6 = scmp.lt.s32.totalorder %s18_s18, %s18_s18 }
   0xf   :  { %p278_p5 = scmp.ne.s32.totalorder %s18_s18, %s277_s24  ;;  %p283_p7 = scmp.lt.s32.totalorder %s277_s24, %s277_s24 }
  0x11   :  { %p284_p8 = por %p283_p7, %p282_p6 }
  0x13   :  { %p285_p9 = pnand %p284_p8, %p278_p5 }
  0x15   :  { %288 = shalt.err (!%p285_p9)
}
  0x16   :  { %23 = dma.hbm_to_vmem [thread:$0]  %s385_s0, 128, %s18_s18, [#allocation3], %s337_s20, %s337_s20, %s338_s21  }
  0x17   :  { %s339_s27 = smov [#allocation7]  }
  0x18   :  { %s41_s28 = sshll.u32 %s339_s27, 4  ;;  %s42_s28 = int_to_ptr.vmem [resolvable:$true] %s41_s28 }
  0x19   :  { %s297_s29 = scalar_lea.vmem %s42_s28, 128  ;;  %p302_p11 = scmp.lt.s32.totalorder %s42_s28, %s42_s28 }
  0x1a   :  { %p298_p10 = scmp.ne.s32.totalorder %s42_s28, %s297_s29  ;;  %p303_p12 = scmp.lt.s32.totalorder %s297_s29, %s297_s29 }
  0x1c   :  { %p304_p13 = por %p303_p12, %p302_p11 }
  0x1e   :  { %p305_p0 = pnand %p304_p13, %p298_p10 }
  0x20   :  { %308 = shalt.err (!%p305_p0)
}
  0x21   :  { %47 = dma.hbm_to_vmem [thread:$0]  %s387_s2, 128, %s42_s28, [#allocation6], %s337_s20, %s337_s20, %s338_s21  }
  0x22   :  { %329 = dma.done.wait [#allocation3], 128  }
  0x23   :  { %330 = vsyncadd [#allocation3], 4294967168 }
  0x24   :  { %331 = dma.done.wait [#allocation6], 384  }
  0x25   :  { %332 = vsyncadd [#allocation6], 4294966912  ;;  %v340_v0 = vmov 0.0   ;;  %vm341_vm0 = vmmov 0   ;;  %v245_v1 = vld [vmem:[#allocation5 + $0x8] sm:$0xff]   ;;  %v246_v2 = vld [vmem:[#allocation5] sm:$0xff]  }
  0x26   :  { %221 = vmatprep.subr.bf16.mxu0 %v340_v0  ;;  %225 = vmatprep.mubr.msk.bf16.mxu0 %vm341_vm0, %v340_v0  ;;  %v247_v3 = vld [vmem:[#allocation2] sm:$0xff]   ;;  %vm83_vm1 = vcmask 261120   ;;  %v248_v9 = vld [vmem:[#allocation7] sm:$0xff]   ;;  %vm143_vm2 = vcmask 130048   ;;  %vm188_vm3 = vcmask 523264   ;;  %s342_s5 = smov [#allocation8]  }
  0x27   :  { %229 = vmatprep.subr.bf16.mxu1 %v340_v0  ;;  %231 = vmatprep.mubr.msk.bf16.mxu1 %vm341_vm0, %v340_v0  ;;  %v213_v10 = vld [vmem:[%s388_s3] ss:$0 sm:$0xff]  ;;  %s196_s6 = sshll.u32 %s342_s5, 4  ;;  %s197_s6 = int_to_ptr.vmem [resolvable:$true] %s196_s6 }
  0x28   :  { %222 = vmatpush3.bf16.msra.mxu0 %v245_v1  ;;  %s309_s7 = scalar_lea.vmem %s197_s6, 256  ;;  %p314_p2 = scmp.lt.s32.totalorder %s197_s6, %s197_s6 }
  0x29   :  { %223 = vmatprep.subr.bf16.mxu0 %v340_v0  ;;  %p310_p1 = scmp.ne.s32.totalorder %s197_s6, %s309_s7  ;;  %p315_p3 = scmp.lt.s32.totalorder %s309_s7, %s309_s7 }
  0x2b   :  { %p316_p4 = por %p315_p3, %p314_p2 }
  0x2c   :  { %224 = vmatpush3.bf16.msra.mxu0 %v246_v2 }
  0x2d   :  { %p317_p5 = pnand %p316_p4, %p310_p1 }
  0x2f   :  { %226 = vmatmul.mubr.msk.bf16.vlgmr.msra.gmra.mxu0 %vm83_vm1, %v247_v3 }
  0xef   :  { %v121_v4 = vpop.f32.mrf.mxu0 }
  0xf1   :  { %v227_v5 = vpop.f32.mrf.mxu0 }
  0xf3   :  { %v124_v6 = vpop.f32.mrf.mxu0 }
  0xf4   :  { %v130_v7 = vpack.c.bf16 %v124_v6, %v121_v4 }
  0xf5   :  { %v228_v8 = vpop.f32.mrf.mxu0 }
  0xf6   :  { %230 = vmatpush3.bf16.msra.mxu1 %v130_v7 }
  0xf9   :  { %232 = vmatmul.mubr.msk.bf16.vlgmr.msra.gmra.mxu1 %vm143_vm2, %v248_v9 }
 0x1b9   :  { %v181_v11 = vpop.f32.mrf.mxu1 }
 0x1ba   :  { %v182_v12 = vadd.f32 %v213_v10, %v181_v11 }
 0x1bb   :  { %v233_v13 = vpop.f32.mrf.mxu1 }
 0x1bc   :  { %189 = vst.msk [vmem:[#allocation8] sm:$0xff] %vm188_vm3, %v182_v12 }
 0x1bd   :  { %v184_v14 = vpop.f32.mrf.mxu1 }
 0x1be   :  { %v185_v15 = vadd.f32 %v213_v10, %v184_v14 }
 0x1bf   :  { %v234_v16 = vpop.f32.mrf.mxu1 }
 0x1c0   :  { %190 = vst.msk [vmem:[#allocation8 + $0x8] sm:$0xff] %vm188_vm3, %v185_v15 }
 0x1c1   :  { %320 = shalt.err (!%p317_p5)
}
 0x1c2   :  { %s343_s3 = smov 128   ;;  %s344_s8 = smov 8  }
 0x1c3   :  { %202 = dma.vmem_to_hbm [thread:$0]  %s197_s6, 256, %s389_s4, [#allocation4], %s343_s3, %s343_s3, %s344_s8  }
 0x1c4   :  { %333 = dma.done.wait [#allocation4], 256  }
 0x1c5   :  { %334 = vsyncadd [#allocation4], 4294967040 }
 0x1c6   :  { %206 = vsyncpa [#allocation3], 1 }
 0x1c7   :  { %207 = vsyncpa [#allocation6], 1 }
 0x1c8   :  { %208 = vsyncpa [#allocation4], 1 }

</bundles_post_ra>
